<compile_context>
chip_gen: v5e
topology: v5e:2x2
jax: 0.10.0
libtpu: 0.0.40
codegen_flags: <defaults>
</compile_context>

<pallas_src>
import math
from collections import OrderedDict

import jax
import jax.numpy as jnp
from jax.experimental import pallas as pl
from jax.experimental.pallas import tpu as pltpu

LN_EPS = 1e-5  # PyTorch nn.LayerNorm default


def _round_up(x, m):
    return ((x + m - 1) // m) * m


# ------------------------------- Pallas kernel -------------------------------
def _make_fused_kernel(num_hidden_layers):
    """Kernel over grid (net n, out-column tile j).

    Refs (after leading net-dim squeeze):
      z:(B,In) bf16, w0:(In,H) bf16, b0/g0/be0:(1,H) f32,
      [wh:(L,H,H) bf16, bh/gh/beh:(L,1,H) f32]  (only if L>0),
      wo:(H,TP) bf16, bo:(1,TP) f32, out:(B,TP) f32
    """

    def kernel(z_ref, w0_ref, b0_ref, g0_ref, be0_ref, *rest):
        if num_hidden_layers > 0:
            wh_ref, bh_ref, gh_ref, beh_ref, wo_ref, bo_ref, out_ref = rest
        else:
            wo_ref, bo_ref, out_ref = rest

        def ln_relu(h, gamma, beta):
            mu = jnp.mean(h, axis=-1, keepdims=True)
            var = jnp.mean(jnp.square(h - mu), axis=-1, keepdims=True)  # biased
            hn = (h - mu) * jax.lax.rsqrt(var + LN_EPS)
            return jnp.maximum(hn * gamma + beta, 0.0)

        # First FCLayer: Linear -> LayerNorm -> ReLU (bf16 inputs, f32 accum/LN).
        h = jnp.dot(z_ref[...], w0_ref[...],
                    preferred_element_type=jnp.float32) + b0_ref[...]
        h = ln_relu(h, g0_ref[...], be0_ref[...])

        # Hidden FCLayers (small static trip count -> unrolled).
        for l in range(num_hidden_layers):
            h = jnp.dot(h.astype(wh_ref.dtype), wh_ref[l],
                        preferred_element_type=jnp.float32) + bh_ref[l]
            h = ln_relu(h, gh_ref[l], beh_ref[l])

        # Outermost linear (no norm / nonlinearity), current output-column tile.
        out_ref[...] = (jnp.dot(h.astype(wo_ref.dtype), wo_ref[...],
                                preferred_element_type=jnp.float32)
                        + bo_ref[...])

    return kernel


def fused_fcblocks_forward(z_bf16, p, num_hidden_layers, tile_p):
    """Run all FCBlocks in one pallas_call. Returns (N, B, P) f32."""
    B, In = z_bf16.shape
    N, H, P = p["wo"].shape
    num_jt = P // tile_p

    trunk3 = lambda n, j: (n, 0, 0)        # net-indexed, j-invariant 3-D arrays
    trunk4 = lambda n, j: (n, 0, 0, 0)     # net-indexed, j-invariant 4-D arrays

    in_specs = [
        pl.BlockSpec((B, In), lambda n, j: (0, 0)),          # z shared by all nets
        pl.BlockSpec((None, In, H), trunk3),                  # w0
        pl.BlockSpec((None, 1, H), trunk3),                   # b0
        pl.BlockSpec((None, 1, H), trunk3),                   # g0
        pl.BlockSpec((None, 1, H), trunk3),                   # be0
    ]
    inputs = [z_bf16, p["w0"], p["b0"], p["g0"], p["be0"]]

    if num_hidden_layers > 0:
        L = p["wh"].shape[1]
        in_specs += [
            pl.BlockSpec((None, L, H, H), trunk4),            # wh
            pl.BlockSpec((None, L, 1, H), trunk4),            # bh
            pl.BlockSpec((None, L, 1, H), trunk4),            # gh
            pl.BlockSpec((None, L, 1, H), trunk4),            # beh
        ]
        inputs += [p["wh"], p["bh"], p["gh"], p["beh"]]

    in_specs += [
        pl.BlockSpec((None, H, tile_p), lambda n, j: (n, 0, j)),   # wo (streamed by j)
        pl.BlockSpec((None, 1, tile_p), lambda n, j: (n, 0, j)),   # bo
    ]
    inputs += [p["wo"], p["bo"]]

    return pl.pallas_call(
        _make_fused_kernel(num_hidden_layers),
        out_shape=jax.ShapeDtypeStruct((N, B, P), jnp.float32),
        grid=(N, num_jt),
        in_specs=in_specs,
        out_specs=pl.BlockSpec((None, B, tile_p), lambda n, j: (n, 0, j)),
        compiler_params=pltpu.CompilerParams(
            # Both axes are independent -> shard across v7x's 2 TensorCores.
            dimension_semantics=("parallel", "parallel"),
            # Explicit scoped-VMEM budget (v5e default is only 16 MiB).
            vmem_limit_bytes=32 * 1024 * 1024,
        ),
    )(*inputs)


# ----------------------------- parameter set-up -------------------------------
def _kaiming_in_out(key, fan_in, fan_out, scale=1.0):
    """kaiming_normal_(fan_in, relu) on a PyTorch (out, in) weight, returned
    transposed to (in, out) for the x @ W convention."""
    std = (2.0 / fan_in) ** 0.5
    w = std * jax.random.normal(key, (fan_out, fan_in), jnp.float32) * scale
    return w.T  # (in, out)


def _bias_init(key, fan_in, fan_out):
    bound = 1.0 / (fan_in ** 0.5)
    return jax.random.uniform(key, (1, fan_out), jnp.float32, -bound, bound)


def init_fcblock(key, in_features, out_features, num_hidden_layers, hidden_ch,
                 last_layer_scale=0.1):
    """Deterministic synthetic init mirroring FCBlock + hyper_*_init (w/10)."""
    keys = jax.random.split(key, 4 + 2 * max(num_hidden_layers, 1))
    p = {}
    p["w0"] = _kaiming_in_out(keys[0], in_features, hidden_ch)
    p["b0"] = _bias_init(keys[1], in_features, hidden_ch)
    p["g0"] = jnp.ones((1, hidden_ch), jnp.float32)
    p["be0"] = jnp.zeros((1, hidden_ch), jnp.float32)
    whs, bhs = [], []
    for l in range(num_hidden_layers):
        whs.append(_kaiming_in_out(keys[2 + 2 * l], hidden_ch, hidden_ch))
        bhs.append(_bias_init(keys[3 + 2 * l], hidden_ch, hidden_ch))
    if num_hidden_layers > 0:
        p["wh"] = jnp.stack(whs, axis=0)                             # (L, H, H)
        p["bh"] = jnp.stack(bhs, axis=0)                             # (L, 1, H)
        p["gh"] = jnp.ones((num_hidden_layers, 1, hidden_ch), jnp.float32)
        p["beh"] = jnp.zeros((num_hidden_layers, 1, hidden_ch), jnp.float32)
    # outermost linear: kaiming / 10 (hyper_weight_init / hyper_bias_init)
    p["wo"] = _kaiming_in_out(keys[-2], hidden_ch, out_features,
                              scale=last_layer_scale)
    p["bo"] = _bias_init(keys[-1], hidden_ch, out_features)
    return p


class HyperNetworkPallas:
    """JAX/Pallas port of HyperNetwork: all per-parameter FCBlocks fused into
    one gridded Pallas kernel with a lane-dense concatenated output."""

    def __init__(self, hyper_in_features, hyper_hidden_layers,
                 hyper_hidden_features, hypo_param_shapes, key):
        self.names = []
        self.param_shapes = []
        self.out_features = []
        self.num_hidden_layers = int(hyper_hidden_layers)
        H = int(hyper_hidden_features)

        nets = []
        for i, (name, shape) in enumerate(hypo_param_shapes.items()):
            shape = tuple(int(s) for s in shape)
            o = int(math.prod(shape))
            self.names.append(name)
            self.param_shapes.append(shape)
            self.out_features.append(o)
            nets.append(init_fcblock(jax.random.fold_in(key, i),
                                     hyper_in_features, o,
                                     self.num_hidden_layers, H))

        # Lane-dense padded output width P (multiple of 128), tiled by tile_p so a
        # large wo streams HBM->VMEM instead of needing full VMEM residency.
        max_out = max(self.out_features)
        if max_out <= 1024:
            self.tile_p = _round_up(max_out, 128)
            P = self.tile_p
        else:
            self.tile_p = 1024
            P = _round_up(max_out, self.tile_p)
        self.padded_out = P

        # Stack per-net params along a leading "net" axis; weights in bf16,
        # bias / layernorm affine in f32. wo/bo zero-padded to P columns.
        def pad_cols(x, width):
            return jnp.pad(x, ((0, 0), (0, width - x.shape[-1])))

        st = {}
        st["w0"] = jnp.stack([n["w0"] for n in nets]).astype(jnp.bfloat16)   # (N,In,H)
        st["b0"] = jnp.stack([n["b0"] for n in nets])                         # (N,1,H)
        st["g0"] = jnp.stack([n["g0"] for n in nets])
        st["be0"] = jnp.stack([n["be0"] for n in nets])
        if self.num_hidden_layers > 0:
            st["wh"] = jnp.stack([n["wh"] for n in nets]).astype(jnp.bfloat16)  # (N,L,H,H)
            st["bh"] = jnp.stack([n["bh"] for n in nets])                        # (N,L,1,H)
            st["gh"] = jnp.stack([n["gh"] for n in nets])
            st["beh"] = jnp.stack([n["beh"] for n in nets])
        st["wo"] = jnp.stack([pad_cols(n["wo"], P) for n in nets]).astype(jnp.bfloat16)  # (N,H,P)
        st["bo"] = jnp.stack([pad_cols(n["bo"], P) for n in nets])                        # (N,1,P)
        self.stacked = st

    def __call__(self, z):
        z_bf16 = z.astype(jnp.bfloat16)   # cast once (weight-streaming regime)
        out = fused_fcblocks_forward(z_bf16, self.stacked,
                                     self.num_hidden_layers, self.tile_p)  # (N,B,P)
        params = OrderedDict()
        for i, (name, shape, o) in enumerate(zip(self.names, self.param_shapes,
                                                 self.out_features)):
            params[name] = out[i, :, :o].reshape((-1,) + shape)
        return params


# ------------------------------ pure-JAX reference ----------------------------
def _fcblock_ref(z_bf16, w0, b0, g0, be0, wh, bh, gh, beh, wo, bo):
    """Same bf16-weight / f32-accumulate math as the kernel, in plain JAX."""

    def ln_relu(h, g, b):
        mu = jnp.mean(h, axis=-1, keepdims=True)
        var = jnp.mean(jnp.square(h - mu), axis=-1, keepdims=True)
        return jnp.maximum((h - mu) * jax.lax.rsqrt(var + LN_EPS) * g + b, 0.0)

    h = jnp.dot(z_bf16, w0, preferred_element_type=jnp.float32) + b0
    h = ln_relu(h, g0, be0)
    L = 0 if wh is None else wh.shape[0]
    for l in range(L):
        h = jnp.dot(h.astype(jnp.bfloat16), wh[l],
                    preferred_element_type=jnp.float32) + bh[l]
        h = ln_relu(h, gh[l], beh[l])
    return jnp.dot(h.astype(jnp.bfloat16), wo,
                   preferred_element_type=jnp.float32) + bo


# ------------------------------------ main -------------------------------------
if __name__ == "__main__":
    key = jax.random.PRNGKey(0)

    # Hypo module: a tiny 2-layer MLP (8 -> 16 -> 4); these are the parameter
    # shapes the hypernetwork predicts.
    hypo_param_shapes = OrderedDict([
        ("net.0.weight", (16, 8)),
        ("net.0.bias", (16,)),
        ("net.1.weight", (4, 16)),
        ("net.1.bias", (4,)),
    ])

    hyper_in_features = 32
    hyper_hidden_layers = 1
    hyper_hidden_features = 128   # full 128-lane trunk width
    batch = 2

    hn = HyperNetworkPallas(hyper_in_features, hyper_hidden_layers,
                            hyper_hidden_features, hypo_param_shapes,
                            jax.random.fold_in(key, 123))

    z = jax.random.normal(jax.random.fold_in(key, 7),
                          (batch, hyper_in_features), jnp.float32)

    params = hn(z)
    for v in params.values():
        jax.block_until_ready(v)

    # Sanity check against a pure-JAX reference using the same bf16 weights.
    st = hn.stacked
    z_bf16 = z.astype(jnp.bfloat16)
    for i, (name, shape, o) in enumerate(zip(hn.names, hn.param_shapes,
                                             hn.out_features)):
        wh_i = st["wh"][i] if hn.num_hidden_layers > 0 else None
        bh_i = st["bh"][i] if hn.num_hidden_layers > 0 else None
        gh_i = st["gh"][i] if hn.num_hidden_layers > 0 else None
        beh_i = st["beh"][i] if hn.num_hidden_layers > 0 else None
        ref_full = _fcblock_ref(z_bf16, st["w0"][i], st["b0"][i], st["g0"][i],
                                st["be0"][i], wh_i, bh_i, gh_i, beh_i,
                                st["wo"][i], st["bo"][i])
        ref = ref_full[:, :o].reshape((-1,) + shape)
        got = params[name]
        assert got.shape == (batch,) + shape, (name, got.shape)
        err = float(jnp.max(jnp.abs(got - ref)))
        assert err < 1e-2, (name, err)

    print("KERNEL_OK")
</pallas_src>

<mosaic_0001>
module attributes {stable_mosaic.version = 11 : i64} {
  func.func @kernel(%arg0: i32, %arg1: i32, %arg2: memref<2x32xbf16, #tpu.memory_space<vmem>>, %arg3: memref<1x32x128xbf16, #tpu.memory_space<vmem>>, %arg4: memref<1x1x128xf32, #tpu.memory_space<vmem>>, %arg5: memref<1x1x128xf32, #tpu.memory_space<vmem>>, %arg6: memref<1x1x128xf32, #tpu.memory_space<vmem>>, %arg7: memref<1x1x128x128xbf16, #tpu.memory_space<vmem>>, %arg8: memref<1x1x1x128xf32, #tpu.memory_space<vmem>>, %arg9: memref<1x1x1x128xf32, #tpu.memory_space<vmem>>, %arg10: memref<1x1x1x128xf32, #tpu.memory_space<vmem>>, %arg11: memref<1x128x128xbf16, #tpu.memory_space<vmem>>, %arg12: memref<1x1x128xf32, #tpu.memory_space<vmem>>, %arg13: memref<1x2x128xf32, #tpu.memory_space<vmem>>) attributes {dimension_semantics = [#tpu.dimension_semantics<parallel>, #tpu.dimension_semantics<parallel>], iteration_bounds = array<i64: 4, 1>, scalar_prefetch = 0 : i64, scratch_operands = 0 : i64, tpu.core_type = #tpu.core_type<tc>, window_params = [{pipeline_mode = #tpu.pipeline_mode<synchronous>, transform_indices = @transform_0, window_bounds = array<i64: 2, 32>}, {transform_indices = @transform_1, window_bounds = array<i64: 1, 32, 128>}, {transform_indices = @transform_2, window_bounds = array<i64: 1, 1, 128>}, {transform_indices = @transform_3, window_bounds = array<i64: 1, 1, 128>}, {transform_indices = @transform_4, window_bounds = array<i64: 1, 1, 128>}, {transform_indices = @transform_5, window_bounds = array<i64: 1, 1, 128, 128>}, {transform_indices = @transform_6, window_bounds = array<i64: 1, 1, 1, 128>}, {transform_indices = @transform_7, window_bounds = array<i64: 1, 1, 1, 128>}, {transform_indices = @transform_8, window_bounds = array<i64: 1, 1, 1, 128>}, {transform_indices = @transform_9, window_bounds = array<i64: 1, 128, 128>}, {transform_indices = @transform_10, window_bounds = array<i64: 1, 1, 128>}, {transform_indices = @transform_11, window_bounds = array<i64: 1, 2, 128>}]} {
    %c0 = arith.constant 0 : index
    %c0_0 = arith.constant 0 : index
    %0 = vector.load %arg2[%c0, %c0_0] : memref<2x32xbf16, #tpu.memory_space<vmem>>, vector<2x32xbf16>
    %c0_1 = arith.constant 0 : index
    %c0_2 = arith.constant 0 : index
    %c0_3 = arith.constant 0 : index
    %1 = vector.load %arg3[%c0_1, %c0_2, %c0_3] : memref<1x32x128xbf16, #tpu.memory_space<vmem>>, vector<1x32x128xbf16>
    %2 = vector.shape_cast %1 : vector<1x32x128xbf16> to vector<32x128xbf16>
    %cst = arith.constant dense<0.000000e+00> : vector<2x128xf32>
    %3 = tpu.matmul %0, %2, %cst {dimension_numbers = #tpu.dot_dimension_numbers<[1], [0], [0], [1], [0, 0, 1, 1], [], []>} : vector<2x32xbf16>, vector<32x128xbf16>, vector<2x128xf32> -> vector<2x128xf32>
    %c0_4 = arith.constant 0 : index
    %c0_5 = arith.constant 0 : index
    %c0_6 = arith.constant 0 : index
    %4 = vector.load %arg4[%c0_4, %c0_5, %c0_6] : memref<1x1x128xf32, #tpu.memory_space<vmem>>, vector<1x1x128xf32>
    %5 = vector.shape_cast %4 : vector<1x1x128xf32> to vector<1x128xf32>
    %6 = vector.broadcast %5 : vector<1x128xf32> to vector<2x128xf32>
    %7 = arith.addf %3, %6 : vector<2x128xf32>
    %c0_7 = arith.constant 0 : index
    %c0_8 = arith.constant 0 : index
    %c0_9 = arith.constant 0 : index
    %8 = vector.load %arg5[%c0_7, %c0_8, %c0_9] : memref<1x1x128xf32, #tpu.memory_space<vmem>>, vector<1x1x128xf32>
    %9 = vector.shape_cast %8 : vector<1x1x128xf32> to vector<1x128xf32>
    %c0_10 = arith.constant 0 : index
    %c0_11 = arith.constant 0 : index
    %c0_12 = arith.constant 0 : index
    %10 = vector.load %arg6[%c0_10, %c0_11, %c0_12] : memref<1x1x128xf32, #tpu.memory_space<vmem>>, vector<1x1x128xf32>
    %11 = vector.shape_cast %10 : vector<1x1x128xf32> to vector<1x128xf32>
    %cst_13 = arith.constant dense<0.000000e+00> : vector<2xf32>
    %12 = vector.multi_reduction <add>, %7, %cst_13 [1] : vector<2x128xf32> to vector<2xf32>
    %13 = vector.shape_cast %12 : vector<2xf32> to vector<2x1xf32>
    %cst_14 = arith.constant 1.280000e+02 : f32
    %14 = vector.broadcast %cst_14 : f32 to vector<2x1xf32>
    %15 = arith.divf %13, %14 : vector<2x1xf32>
    %16 = vector.broadcast %15 : vector<2x1xf32> to vector<2x128xf32>
    %17 = arith.subf %7, %16 : vector<2x128xf32>
    %18 = arith.mulf %17, %17 : vector<2x128xf32>
    %cst_15 = arith.constant dense<0.000000e+00> : vector<2xf32>
    %19 = vector.multi_reduction <add>, %18, %cst_15 [1] : vector<2x128xf32> to vector<2xf32>
    %20 = vector.shape_cast %19 : vector<2xf32> to vector<2x1xf32>
    %cst_16 = arith.constant 1.280000e+02 : f32
    %21 = vector.broadcast %cst_16 : f32 to vector<2x1xf32>
    %22 = arith.divf %20, %21 : vector<2x1xf32>
    %23 = vector.broadcast %15 : vector<2x1xf32> to vector<2x128xf32>
    %24 = arith.subf %7, %23 : vector<2x128xf32>
    %cst_17 = arith.constant 9.99999974E-6 : f32
    %25 = vector.broadcast %cst_17 : f32 to vector<2x1xf32>
    %26 = arith.addf %22, %25 : vector<2x1xf32>
    %27 = math.rsqrt %26 : vector<2x1xf32>
    %28 = vector.broadcast %27 : vector<2x1xf32> to vector<2x128xf32>
    %29 = arith.mulf %24, %28 : vector<2x128xf32>
    %30 = vector.broadcast %9 : vector<1x128xf32> to vector<2x128xf32>
    %31 = arith.mulf %29, %30 : vector<2x128xf32>
    %32 = vector.broadcast %11 : vector<1x128xf32> to vector<2x128xf32>
    %33 = arith.addf %31, %32 : vector<2x128xf32>
    %cst_18 = arith.constant 0.000000e+00 : f32
    %34 = vector.broadcast %cst_18 : f32 to vector<2x128xf32>
    %35 = arith.maximumf %33, %34 : vector<2x128xf32>
    %36 = arith.truncf %35 : vector<2x128xf32> to vector<2x128xbf16>
    %c0_19 = arith.constant 0 : index
    %c0_20 = arith.constant 0 : index
    %c0_21 = arith.constant 0 : index
    %c0_22 = arith.constant 0 : index
    %37 = vector.load %arg7[%c0_19, %c0_20, %c0_21, %c0_22] : memref<1x1x128x128xbf16, #tpu.memory_space<vmem>>, vector<1x1x128x128xbf16>
    %38 = vector.shape_cast %37 : vector<1x1x128x128xbf16> to vector<128x128xbf16>
    %cst_23 = arith.constant dense<0.000000e+00> : vector<2x128xf32>
    %39 = tpu.matmul %36, %38, %cst_23 {dimension_numbers = #tpu.dot_dimension_numbers<[1], [0], [0], [1], [0, 0, 1, 1], [], []>} : vector<2x128xbf16>, vector<128x128xbf16>, vector<2x128xf32> -> vector<2x128xf32>
    %c0_24 = arith.constant 0 : index
    %c0_25 = arith.constant 0 : index
    %c0_26 = arith.constant 0 : index
    %c0_27 = arith.constant 0 : index
    %40 = vector.load %arg8[%c0_24, %c0_25, %c0_26, %c0_27] : memref<1x1x1x128xf32, #tpu.memory_space<vmem>>, vector<1x1x1x128xf32>
    %41 = vector.shape_cast %40 : vector<1x1x1x128xf32> to vector<1x128xf32>
    %42 = vector.broadcast %41 : vector<1x128xf32> to vector<2x128xf32>
    %43 = arith.addf %39, %42 : vector<2x128xf32>
    %c0_28 = arith.constant 0 : index
    %c0_29 = arith.constant 0 : index
    %c0_30 = arith.constant 0 : index
    %c0_31 = arith.constant 0 : index
    %44 = vector.load %arg9[%c0_28, %c0_29, %c0_30, %c0_31] : memref<1x1x1x128xf32, #tpu.memory_space<vmem>>, vector<1x1x1x128xf32>
    %45 = vector.shape_cast %44 : vector<1x1x1x128xf32> to vector<1x128xf32>
    %c0_32 = arith.constant 0 : index
    %c0_33 = arith.constant 0 : index
    %c0_34 = arith.constant 0 : index
    %c0_35 = arith.constant 0 : index
    %46 = vector.load %arg10[%c0_32, %c0_33, %c0_34, %c0_35] : memref<1x1x1x128xf32, #tpu.memory_space<vmem>>, vector<1x1x1x128xf32>
    %47 = vector.shape_cast %46 : vector<1x1x1x128xf32> to vector<1x128xf32>
    %cst_36 = arith.constant dense<0.000000e+00> : vector<2xf32>
    %48 = vector.multi_reduction <add>, %43, %cst_36 [1] : vector<2x128xf32> to vector<2xf32>
    %49 = vector.shape_cast %48 : vector<2xf32> to vector<2x1xf32>
    %cst_37 = arith.constant 1.280000e+02 : f32
    %50 = vector.broadcast %cst_37 : f32 to vector<2x1xf32>
    %51 = arith.divf %49, %50 : vector<2x1xf32>
    %52 = vector.broadcast %51 : vector<2x1xf32> to vector<2x128xf32>
    %53 = arith.subf %43, %52 : vector<2x128xf32>
    %54 = arith.mulf %53, %53 : vector<2x128xf32>
    %cst_38 = arith.constant dense<0.000000e+00> : vector<2xf32>
    %55 = vector.multi_reduction <add>, %54, %cst_38 [1] : vector<2x128xf32> to vector<2xf32>
    %56 = vector.shape_cast %55 : vector<2xf32> to vector<2x1xf32>
    %cst_39 = arith.constant 1.280000e+02 : f32
    %57 = vector.broadcast %cst_39 : f32 to vector<2x1xf32>
    %58 = arith.divf %56, %57 : vector<2x1xf32>
    %59 = vector.broadcast %51 : vector<2x1xf32> to vector<2x128xf32>
    %60 = arith.subf %43, %59 : vector<2x128xf32>
    %cst_40 = arith.constant 9.99999974E-6 : f32
    %61 = vector.broadcast %cst_40 : f32 to vector<2x1xf32>
    %62 = arith.addf %58, %61 : vector<2x1xf32>
    %63 = math.rsqrt %62 : vector<2x1xf32>
    %64 = vector.broadcast %63 : vector<2x1xf32> to vector<2x128xf32>
    %65 = arith.mulf %60, %64 : vector<2x128xf32>
    %66 = vector.broadcast %45 : vector<1x128xf32> to vector<2x128xf32>
    %67 = arith.mulf %65, %66 : vector<2x128xf32>
    %68 = vector.broadcast %47 : vector<1x128xf32> to vector<2x128xf32>
    %69 = arith.addf %67, %68 : vector<2x128xf32>
    %cst_41 = arith.constant 0.000000e+00 : f32
    %70 = vector.broadcast %cst_41 : f32 to vector<2x128xf32>
    %71 = arith.maximumf %69, %70 : vector<2x128xf32>
    %72 = arith.truncf %71 : vector<2x128xf32> to vector<2x128xbf16>
    %c0_42 = arith.constant 0 : index
    %c0_43 = arith.constant 0 : index
    %c0_44 = arith.constant 0 : index
    %73 = vector.load %arg11[%c0_42, %c0_43, %c0_44] : memref<1x128x128xbf16, #tpu.memory_space<vmem>>, vector<1x128x128xbf16>
    %74 = vector.shape_cast %73 : vector<1x128x128xbf16> to vector<128x128xbf16>
    %cst_45 = arith.constant dense<0.000000e+00> : vector<2x128xf32>
    %75 = tpu.matmul %72, %74, %cst_45 {dimension_numbers = #tpu.dot_dimension_numbers<[1], [0], [0], [1], [0, 0, 1, 1], [], []>} : vector<2x128xbf16>, vector<128x128xbf16>, vector<2x128xf32> -> vector<2x128xf32>
    %c0_46 = arith.constant 0 : index
    %c0_47 = arith.constant 0 : index
    %c0_48 = arith.constant 0 : index
    %76 = vector.load %arg12[%c0_46, %c0_47, %c0_48] : memref<1x1x128xf32, #tpu.memory_space<vmem>>, vector<1x1x128xf32>
    %77 = vector.shape_cast %76 : vector<1x1x128xf32> to vector<1x128xf32>
    %78 = vector.broadcast %77 : vector<1x128xf32> to vector<2x128xf32>
    %79 = arith.addf %75, %78 : vector<2x128xf32>
    %c0_49 = arith.constant 0 : index
    %c0_50 = arith.constant 0 : index
    %c0_51 = arith.constant 0 : index
    %80 = vector.load %arg13[%c0_49, %c0_50, %c0_51] : memref<1x2x128xf32, #tpu.memory_space<vmem>>, vector<1x2x128xf32>
    %81 = vector.shape_cast %80 : vector<1x2x128xf32> to vector<2x128xf32>
    %82 = vector.shape_cast %79 : vector<2x128xf32> to vector<1x2x128xf32>
    tpu.vector_store %arg13[%c0_49, %c0_50, %c0_51], %82 {strides = array<i32>} : memref<1x2x128xf32, #tpu.memory_space<vmem>>, vector<1x2x128xf32>,
    return
  }
  func.func @transform_0(%arg0: i32, %arg1: i32) -> (i32, i32) {
    %c0_i32 = arith.constant 0 : i32
    %c0_i32_0 = arith.constant 0 : i32
    %c0_i32_1 = arith.constant 0 : i32
    return %c0_i32, %c0_i32_0 : i32, i32
  }
  func.func @transform_1(%arg0: i32, %arg1: i32) -> (i32, i32, i32) {
    %c0_i32 = arith.constant 0 : i32
    %c0_i32_0 = arith.constant 0 : i32
    %c0_i32_1 = arith.constant 0 : i32
    return %arg0, %c0_i32, %c0_i32_0 : i32, i32, i32
  }
  func.func @transform_2(%arg0: i32, %arg1: i32) -> (i32, i32, i32) {
    %c0_i32 = arith.constant 0 : i32
    %c0_i32_0 = arith.constant 0 : i32
    %c0_i32_1 = arith.constant 0 : i32
    return %arg0, %c0_i32, %c0_i32_0 : i32, i32, i32
  }
  func.func @transform_3(%arg0: i32, %arg1: i32) -> (i32, i32, i32) {
    %c0_i32 = arith.constant 0 : i32
    %c0_i32_0 = arith.constant 0 : i32
    %c0_i32_1 = arith.constant 0 : i32
    return %arg0, %c0_i32, %c0_i32_0 : i32, i32, i32
  }
  func.func @transform_4(%arg0: i32, %arg1: i32) -> (i32, i32, i32) {
    %c0_i32 = arith.constant 0 : i32
    %c0_i32_0 = arith.constant 0 : i32
    %c0_i32_1 = arith.constant 0 : i32
    return %arg0, %c0_i32, %c0_i32_0 : i32, i32, i32
  }
  func.func @transform_5(%arg0: i32, %arg1: i32) -> (i32, i32, i32, i32) {
    %c0_i32 = arith.constant 0 : i32
    %c0_i32_0 = arith.constant 0 : i32
    %c0_i32_1 = arith.constant 0 : i32
    %c0_i32_2 = arith.constant 0 : i32
    return %arg0, %c0_i32, %c0_i32_0, %c0_i32_1 : i32, i32, i32, i32
  }
  func.func @transform_6(%arg0: i32, %arg1: i32) -> (i32, i32, i32, i32) {
    %c0_i32 = arith.constant 0 : i32
    %c0_i32_0 = arith.constant 0 : i32
    %c0_i32_1 = arith.constant 0 : i32
    %c0_i32_2 = arith.constant 0 : i32
    return %arg0, %c0_i32, %c0_i32_0, %c0_i32_1 : i32, i32, i32, i32
  }
  func.func @transform_7(%arg0: i32, %arg1: i32) -> (i32, i32, i32, i32) {
    %c0_i32 = arith.constant 0 : i32
    %c0_i32_0 = arith.constant 0 : i32
    %c0_i32_1 = arith.constant 0 : i32
    %c0_i32_2 = arith.constant 0 : i32
    return %arg0, %c0_i32, %c0_i32_0, %c0_i32_1 : i32, i32, i32, i32
  }
  func.func @transform_8(%arg0: i32, %arg1: i32) -> (i32, i32, i32, i32) {
    %c0_i32 = arith.constant 0 : i32
    %c0_i32_0 = arith.constant 0 : i32
    %c0_i32_1 = arith.constant 0 : i32
    %c0_i32_2 = arith.constant 0 : i32
    return %arg0, %c0_i32, %c0_i32_0, %c0_i32_1 : i32, i32, i32, i32
  }
  func.func @transform_9(%arg0: i32, %arg1: i32) -> (i32, i32, i32) {
    %c0_i32 = arith.constant 0 : i32
    %c0_i32_0 = arith.constant 0 : i32
    return %arg0, %c0_i32, %arg1 : i32, i32, i32
  }
  func.func @transform_10(%arg0: i32, %arg1: i32) -> (i32, i32, i32) {
    %c0_i32 = arith.constant 0 : i32
    %c0_i32_0 = arith.constant 0 : i32
    return %arg0, %c0_i32, %arg1 : i32, i32, i32
  }
  func.func @transform_11(%arg0: i32, %arg1: i32) -> (i32, i32, i32) {
    %c0_i32 = arith.constant 0 : i32
    %c0_i32_0 = arith.constant 0 : i32
    return %arg0, %c0_i32, %arg1 : i32, i32, i32
  }
}

</mosaic_0001>

<bundles_post_ra>
// kernel: tpu_custom_call.1
= control target key start
LH: loop header
LB: loop body
LE: loop exit
PB: predicated region body
PF: predicated region fallthrough
CT: control target
= control target key end

     0   :  { %s2255_s0 = inlined_call_operand.hbm [shape: bf16[2,32], index: 0, kind: input, shape index: {}]   ;;  %s2256_s1 = inlined_call_operand.hbm [shape: bf16[4,32,128], index: 1, kind: input, shape index: {}]   ;;  %s2257_s2 = inlined_call_operand.hbm [shape: f32[4,1,128], index: 2, kind: input, shape index: {}]   ;;  %s2258_s3 = inlined_call_operand.hbm [shape: f32[4,1,128], index: 3, kind: input, shape index: {}]   ;;  %s2259_s4 = inlined_call_operand.hbm [shape: f32[4,1,128], index: 4, kind: input, shape index: {}]   ;;  %s2260_s5 = inlined_call_operand.hbm [shape: bf16[4,1,128,128], index: 5, kind: input, shape index: {}]   ;;  %s2261_s6 = inlined_call_operand.vmem [shape: f32[4,1,1,128], index: 6, kind: input, shape index: {}]   ;;  %s2262_s7 = inlined_call_operand.hbm [shape: f32[4,1,1,128], index: 7, kind: input, shape index: {}]   ;;  %s2263_s8 = inlined_call_operand.hbm [shape: f32[4,1,1,128], index: 8, kind: input, shape index: {}]   ;;  %s2264_s9 = inlined_call_operand.hbm [shape: bf16[4,128,128], index: 9, kind: input, shape index: {}]   ;;  %s2265_s10 = inlined_call_operand.vmem [shape: f32[4,1,128], index: 10, kind: input, shape index: {}]   ;;  %s2266_s11 = inlined_call_operand.hbm [shape: f32[4,2,128], index: 11, kind: output, shape index: {}]  }
   0x1   :  { %2280 = sst [smem:[#allocation29_spill]] %s2255_s0 }
   0x2   :  { %2281 = sst [smem:[#allocation30_spill]] %s2256_s1 }
   0x3   :  { %2282 = sst [smem:[#allocation31_spill]] %s2257_s2 }
   0x4   :  { %2283 = sst [smem:[#allocation32_spill]] %s2258_s3 }
   0x5   :  { %2284 = sst [smem:[#allocation33_spill]] %s2260_s5 }
   0x6   :  { %2285 = sst [smem:[#allocation34_spill]] %s2261_s6 }
   0x7   :  { %2286 = sst [smem:[#allocation35_spill]] %s2263_s8 }
   0x8   :  { %2287 = sst [smem:[#allocation36_spill]] %s2264_s9 }
   0x9   :  { %2288 = sst [smem:[#allocation37_spill]] %s2265_s10 }
   0xa   :  { %2289 = sst [smem:[#allocation38_spill]] %s2266_s11 }
   0xb   :  { %16 = vsyncpa [#allocation3], 0 }
   0xc   :  { %17 = vsyncpa [#allocation6], 0 }
   0xd   :  { %19 = vsyncpa [#allocation6 + $0x1], 0 }
   0xe   :  { %20 = vsyncpa [#allocation9], 0 }
   0xf   :  { %22 = vsyncpa [#allocation9 + $0x1], 0 }
  0x10   :  { %23 = vsyncpa [#allocation12], 0 }
  0x11   :  { %25 = vsyncpa [#allocation12 + $0x1], 0 }
  0x12   :  { %26 = vsyncpa [#allocation15], 0 }
  0x13   :  { %28 = vsyncpa [#allocation15 + $0x1], 0 }
  0x14   :  { %29 = vsyncpa [#allocation4], 0 }
  0x15   :  { %31 = vsyncpa [#allocation4 + $0x1], 0  ;;  %s1939_s17 = smov 0   ;;  %s1941_s18 = smov 0  }
  0x16   :  { %s1943_s19 = smov 0   ;;  %s1945_s20 = smov 0  }
  0x17   :  { %s1947_s21 = smov 0   ;;  %s1949_s22 = smov 0  }
  0x18 LB: > { %2290 = sst [smem:[#allocation24_spill]] %s1853_s17  ;;  %s49_s23 = sadd.s32 1, %s1869_s21  ;;  %s1873_s22 = sphi %s1949_s22, %s37_s22   ;;  %s1869_s21 = sphi %s1947_s21, %s2326_s21   ;;  %s1865_s20 = sphi %s1945_s20, %s2325_s20   ;;  %s1861_s19 = sphi %s1943_s19, %s2324_s19   ;;  %s1857_s18 = sphi %s1941_s18, %s2323_s18   ;;  %s1853_s17 = sphi %s1939_s17, %s2322_s17  }
  0x19   : > { %2291 = sst [smem:[#allocation25_spill]] %s1861_s19  ;;  %s77_s24 = sadd.s32 1, %s1861_s19 }
  0x1a   : > { %p51_p0 = scmp.ge.s32.totalorder %s49_s23, 4  ;;  %p84_p1 = scmp.ne.s32.totalorder %s1861_s19, %s1857_s18 }
  0x1b   : > { %p85_p2 = scmp.eq.s32.totalorder %s1873_s22, 0  ;;  %p1437_p4 = scmp.lt.s32.totalorder %s1873_s22, 4 }
  0x1c   : > { %s2328_s23 = smov (%p51_p0, %s49_s23), 0  ;;  %s1987_s27 = sand.u32 1, %s1873_s22  }
  0x1d   : > { %2292 = sst [smem:[#allocation26_spill]] %s2328_s23  ;;  %p1979_p3 = por %p85_p2, %p84_p1 }
  0x1e   : > { %s74_s26 = ssub.s32 %s1869_s21, %s2328_s23  ;;  %s1990_s28 = sand.u32 1, %s1861_s19  }
  0x1f   : > { %p75_p5 = scmp.eq.s32.totalorder %s74_s26, 0  ;;  %s1360_s29 = sshll.u32 %s1869_s21, 4 }
  0x20   : > { %s1268_s12 = sshll.u32 %s1990_s28, 4  ;;  %s2295_s1 = sld [smem:[#allocation30_spill]] }
  0x21   : > { %s1994_s30 = scalar_select %p75_p5, %s1861_s19, %s77_s24  }
  0x22   : > { %s396_s23 = scalar_lea.vmem [#allocation5], %s1268_s12  ;;  %p2004_p6 = pnand %p1437_p4, %p1979_p3 }
  0x23   : > { %2294 = sst [smem:[#allocation27_spill]] %s1994_s30  ;;  %s404_s26 = sshll.u32 %s396_s23, 4  ;;  %s405_s26 = int_to_ptr.vmem [resolvable:$true] %s404_s26 }
  0x24   : > { %s2271_s24 = scalar_lea.sflag [#allocation6], %s1987_s27  ;;  %s2274_s13 = smov 64  }
  0x25   : > { %s2297_s3 = sld [smem:[#allocation32_spill]]  ;;  %s2272_s30 = scalar_lea.sflag [#allocation9], %s1987_s27 }
  0x26   : > { %s401_s15 = scalar_lea.hbm %s2295_s1, %s1360_s29  ;;  %s2275_s29 = smov 4  }
  0x27   : > { %s402_s16 = sshll.u32 %s401_s15, 4  ;;  %s434_s15 = scalar_lea.vmem [#allocation8], %s1990_s28  ;;  %s403_s16 = int_to_ptr.hbm [resolvable:$true] %s402_s16 }
  0x28   : > { %1410 = dma.hbm_to_vmem [thread:$0]  (!%p2004_p6), %s403_s16, 256, %s405_s26, %s2271_s24, %s2274_s13, %s2274_s13, %s2275_s29  }
  0x29   : > { %s441_s1 = sshll.u32 %s434_s15, 4  ;;  %s1271_s10 = sshll.u32 %s1990_s28, 6  ;;  %s442_s1 = int_to_ptr.vmem [resolvable:$true] %s441_s1 }
  0x2a   : > { %s1361_s6 = sshll.u32 %s1869_s21, 6  ;;  %s2298_s5 = sld [smem:[#allocation33_spill]] }
  0x2b   : > { %s437_s25 = scalar_lea.hbm %s2297_s3, %s1869_s21  ;;  %s469_s12 = scalar_lea.vmem [#allocation11], %s1271_s10 }
  0x2c   : > { %s439_s14 = sshll.u32 %s437_s25, 4  ;;  %s477_s25 = sshll.u32 %s469_s12, 4  ;;  %s440_s14 = int_to_ptr.hbm [resolvable:$true] %s439_s14  ;;  %s478_s25 = int_to_ptr.vmem [resolvable:$true] %s477_s25 }
  0x2d   : > { %1416 = dma.hbm_to_vmem [thread:$0]  (!%p2004_p6), %s440_s14, 16, %s442_s1, %s2272_s30  }
  0x2e   : > { %s2276_s15 = scalar_lea.sflag [#allocation12], %s1987_s27  ;;  %s2299_s9 = sld [smem:[#allocation36_spill]] }
  0x2f   : > { %s531_s26 = scalar_lea.vmem [#allocation16], %s1271_s10  ;;  %s2300_s8 = sld [smem:[#allocation35_spill]] }
  0x30   : > { %s474_s23 = scalar_lea.hbm %s2298_s5, %s1361_s6  ;;  %s2273_s10 = scalar_lea.sflag [#allocation15], %s1987_s27 }
  0x31   : > { %s475_s24 = sshll.u32 %s474_s23, 4  ;;  %s540_s23 = sshll.u32 %s531_s26, 4  ;;  %s476_s24 = int_to_ptr.hbm [resolvable:$true] %s475_s24  ;;  %s2042_s23 = int_to_ptr.vmem [resolvable:$true] %s540_s23 }
  0x32   : > { %1422 = dma.hbm_to_vmem [thread:$0]  (!%p2004_p6), %s476_s24, 1024, %s478_s25, %s2276_s15, %s2274_s13, %s2274_s13, %s2275_s29  }
  0x33   : > { %s513_s25 = scalar_lea.vmem [#allocation14], %s1990_s28  ;;  %s2057_s1 = sadd.s32 4294967295, %s1873_s22  }
  0x34   : > { %s537_s16 = scalar_lea.hbm %s2299_s9, %s1361_s6  ;;  %s520_s6 = sshll.u32 %s513_s25, 4  ;;  %s521_s6 = int_to_ptr.vmem [resolvable:$true] %s520_s6 }
  0x35   : > { %s538_s12 = sshll.u32 %s537_s16, 4  ;;  %s516_s5 = scalar_lea.hbm %s2300_s8, %s1869_s21  ;;  %s2044_s12 = int_to_ptr.hbm [resolvable:$true] %s538_s12 }
  0x36   : > { %s518_s24 = sshll.u32 %s516_s5, 4  ;;  %s1264_s3 = sadd.s32 4294967294, %s1873_s22   ;;  %s519_s24 = int_to_ptr.hbm [resolvable:$true] %s518_s24 }
  0x37   : > { %1428 = dma.hbm_to_vmem [thread:$0]  (!%p2004_p6), %s519_s24, 16, %s521_s6, %s2273_s10  }
  0x38   : > { %p90_p7 = scmp.ne.s32.totalorder %s1857_s18, %s1853_s17  ;;  %p91_p8 = scmp.eq.s32.totalorder %s2057_s1, 0 }
  0x39   : > { %p354_p9 = scmp.eq.s32.totalorder %s2057_s1, 3  ;;  %p360_p10 = scmp.eq.s32.totalorder %s1264_s3, 3 }
  0x3a   : > { %p2066_p11 = por %p91_p8, %p90_p7  ;;  %p1265_p12 = scmp.ge.s32.totalorder %s1873_s22, 1 }
  0x3b   : > { %p2074_p13 = por %p354_p9, %p84_p1  ;;  %p2078_p0 = por %p360_p10, %p90_p7 }
  0x3c   : > { %p367_p2 = scmp.lt.s32.totalorder %s1873_s22, 5  ;;  %s2305_s0 = sld [smem:[#allocation29_spill]] }
  0x3d   : > { %s2303_s14 = scalar_select %p2078_p0, 1, 0 }
  0x3e   : > { %p2086_p3 = pnand %p1265_p12, %p367_p2  ;;  %s1877_s6 = smov [#allocation2]  }
  0x3f   : > { %2304 = sst [smem:[#allocation28_spill]] %s2303_s14  ;;  %s381_s3 = sshll.u32 %s1877_s6, 4  ;;  %s382_s3 = int_to_ptr.vmem [resolvable:$true] %s381_s3 }
  0x40   : > { %p1403_p1 = pneg %p2086_p3  ;;  %s2307_s2 = sld [smem:[#allocation31_spill]] }
  0x41   : > { %s417_s26 = scalar_lea.vmem [#allocation7], %s1990_s28  ;;  %s2308_s6 = scalar_lea.sflag [#allocation6], %s1987_s27 }
  0x42   : > { %s379_s24 = sshll.u32 %s2305_s0, 4  ;;  %s424_s29 = sshll.u32 %s417_s26, 4  ;;  %s380_s24 = int_to_ptr.hbm [resolvable:$true] %s379_s24  ;;  %s425_s29 = int_to_ptr.vmem [resolvable:$true] %s424_s29 }
  0x43   : > { %p1404_p4 = pnand %p1403_p1, %p91_p8  ;;  %s454_s0 = scalar_lea.hbm %s2259_s4, %s1869_s21 }
  0x44   : > { %s451_s26 = scalar_lea.vmem [#allocation10], %s1990_s28  ;;  %s456_s8 = sshll.u32 %s454_s0, 4  ;;  %s457_s8 = int_to_ptr.hbm [resolvable:$true] %s456_s8 }
  0x45   : > { %1406 = dma.hbm_to_vmem [thread:$0]  (!%p1404_p4), %s380_s24, 16, %s382_s3, [#allocation3]  }
  0x46   : > { %s420_s16 = scalar_lea.hbm %s2307_s2, %s1869_s21  ;;  %s458_s2 = sshll.u32 %s451_s26, 4  ;;  %s459_s2 = int_to_ptr.vmem [resolvable:$true] %s458_s2 }
  0x47   : > { %s422_s15 = sshll.u32 %s420_s16, 4  ;;  %s2309_s16 = scalar_lea.sflag [#allocation9], %s1987_s27  ;;  %s423_s15 = int_to_ptr.hbm [resolvable:$true] %s422_s15 }
  0x48   : > { %1413 = dma.hbm_to_vmem [thread:$0]  (!%p2004_p6), %s423_s15, 16, %s425_s29, %s2308_s6  }
  0x49   : > { %1419 = dma.hbm_to_vmem [thread:$0]  (!%p2004_p6), %s457_s8, 16, %s459_s2, %s2309_s16  }
  0x4a   : > { %s499_s9 = scalar_lea.hbm %s2262_s7, %s1869_s21  ;;  %s496_s19 = scalar_lea.vmem [#allocation13], %s1990_s28 }
  0x4b   : > { %s503_s14 = sshll.u32 %s496_s19, 4  ;;  %s501_s17 = sshll.u32 %s499_s9, 4  ;;  %s504_s14 = int_to_ptr.vmem [resolvable:$true] %s503_s14  ;;  %s502_s17 = int_to_ptr.hbm [resolvable:$true] %s501_s17 }
  0x4c   : > { %s2310_s29 = scalar_lea.sflag [#allocation12], %s1987_s27  ;;  %s2311_s15 = smov 4  }
  0x4d   : > { %1425 = dma.hbm_to_vmem [thread:$0]  (!%p2004_p6), %s502_s17, 16, %s504_s14, %s2310_s29  }
  0x4e   : > { %s2312_s0 = smov 64   ;;  %s2313_s6 = scalar_lea.sflag [#allocation15], %s1987_s27 }
  0x4f   : > { %1431 = dma.hbm_to_vmem [thread:$0]  (!%p2004_p6), %s2044_s12, 1024, %s2042_s23, %s2313_s6, %s2312_s0, %s2312_s0, %s2311_s15  }
  0x50   : > { %561 = sbr.rel (%p2086_p3) target bundleno = 1047 (0x417), region = 64 }
  0x55   : > { %1828 = dma.done.wait (%p91_p8), [#allocation3], 16  }
  0x56   : > { %1830 = vsyncadd (%p91_p8), [#allocation3], 4294967280  ;;  %s568_s2 = sand.u32 1, %s2057_s1   ;;  %s2138_s8 = sand.u32 1, %s1857_s18  }
  0x57   : > { %s1279_s9 = sshll.u32 %s2138_s8, 4  ;;  %s569_s11 = scalar_lea.sflag [#allocation6], %s568_s2 }
  0x58   : > { %s572_s17 = scalar_lea.vmem [#allocation5], %s1279_s9 }
  0x59   : > { %1832 = dma.done.wait (%p2066_p11), %s569_s11, 272  }
  0x5a   : > { %1834 = vsyncadd (%p2066_p11), %s569_s11, 4294967024  ;;  %s581_s19 = scalar_lea.vmem [#allocation7], %s2138_s8  ;;  %s588_s27 = scalar_lea.sflag [#allocation9], %s568_s2 }
  0x5b   : > { %s590_s28 = scalar_lea.vmem [#allocation8], %s2138_s8 }
  0x5c   : > { %1836 = dma.done.wait (%p2066_p11), %s588_s27, 32  }
  0x5d   : > { %1838 = vsyncadd (%p2066_p11), %s588_s27, 4294967264  ;;  %s1280_s23 = sshll.u32 %s2138_s8, 6  ;;  %s599_s12 = scalar_lea.vmem [#allocation10], %s2138_s8 }
  0x5e   : > { %s606_s1 = scalar_lea.sflag [#allocation12], %s568_s2  ;;  %s2155_s14 = scalar_lea.vmem [#allocation11], %s1280_s23 }
  0x5f   : > { %1840 = dma.done.wait (%p2066_p11), %s606_s1, 1040  }
  0x60   : > { %1842 = vsyncadd (%p2066_p11), %s606_s1, 4294966256  ;;  %s618_s25 = scalar_lea.vmem [#allocation13], %s2138_s8  ;;  %s625_s13 = scalar_lea.sflag [#allocation15], %s568_s2 }
  0x61   : > { %s627_s10 = scalar_lea.vmem [#allocation14], %s2138_s8 }
  0x62   : > { %1844 = dma.done.wait (%p2066_p11), %s625_s13, 1040  }
  0x63   : > { %1846 = vsyncadd (%p2066_p11), %s625_s13, 4294966256  ;;  %v1364_v0 = vld [vmem:[%s572_s17 + $0x8] sm:$0xff]  ;;  %v1363_v1 = vld [vmem:[%s572_s17] sm:$0xff]  ;;  %vm747_vm0 = vcmask 261120   ;;  %vm766_vm1 = vcmask 1041408   ;;  %v1878_v8 = vmov 128.0  }
  0x64   : > { %757 = vmatpush.bf16.msra.mxu0 %v1364_v0  ;;  %v726_v2 = vld [vmem:[#allocation2] sm:$0x1]  ;;  %v1492_v3 = vld [vmem:[%s581_s19] ss:$0 sm:$0xff]  ;;  %1499 = vrcp.f32 %v1878_v8  ;;  %p716_p5 = scmp.lt.s32.totalorder %s1865_s20, 3  ;;  %s2314_s24 = sld [smem:[#allocation34_spill]] }
  0x65   : > { %v1372_v20 = vld [vmem:[%s2155_s14 + $0x38] sm:$0xff]  ;;  %v1371_v21 = vld [vmem:[%s2155_s14 + $0x30] sm:$0xff]  ;;  %v1370_v22 = vld [vmem:[%s2155_s14 + $0x28] sm:$0xff]  ;;  %s2315_s2 = sld [smem:[#allocation37_spill]]  ;;  %s637_s11 = scalar_lea.vmem [#allocation16], %s1280_s23 }
  0x66   : > { %s2174_s5 = scalar_select %p716_p5, %s1865_s20, 3  ;;  %874 = vmatpush.bf16.msra.mxu1 %v1372_v20  ;;  %v1369_v23 = vld [vmem:[%s2155_s14 + $0x20] sm:$0xff]  ;;  %v1368_v24 = vld [vmem:[%s2155_s14 + $0x18] sm:$0xff]  ;;  %v1367_v25 = vld [vmem:[%s2155_s14 + $0x10] sm:$0xff] }
  0x67   : > { %v1366_v26 = vld [vmem:[%s2155_s14 + $0x8] sm:$0xff]  ;;  %v1365_v27 = vld [vmem:[%s2155_s14] sm:$0xff]  ;;  %v1379_v56 = vld [vmem:[%s637_s11 + $0x30] sm:$0xff]  ;;  %s1357_s17 = sshll.u32 %s1865_s20, 1  ;;  %s1282_s19 = sshll.u32 %s2138_s8, 1 }
  0x68   : > { %758 = vmatpush.bf16.msra.mxu0 %v1363_v1  ;;  %v1493_v37 = vld [vmem:[%s590_s28] ss:$0 sm:$0xff]  ;;  %v1380_v55 = vld [vmem:[%s637_s11 + $0x38] sm:$0xff]  ;;  %v1378_v57 = vld [vmem:[%s637_s11 + $0x28] sm:$0xff]  ;;  %s2316_s23 = sld [smem:[#allocation38_spill]]  ;;  %s1004_s20 = scalar_lea.sflag [#allocation4], %s2138_s8 }
  0x69   : > { %v1494_v40 = vld [vmem:[%s599_s12] ss:$0 sm:$0xff]  ;;  %989 = vmatpush.bf16.msra.mxu2 %v1380_v55  ;;  %v1376_v59 = vld [vmem:[%s637_s11 + $0x18] sm:$0xff]  ;;  %v1375_v60 = vld [vmem:[%s637_s11 + $0x10] sm:$0xff] }
  0x6a   : > { %v1500_v9 = vpop.eup %1499  ;;  %s718_s3 = scalar_lea.vmem %s2314_s24, %s2174_s5  ;;  %875 = vmatpush.bf16.msra.mxu1 %v1371_v21  ;;  %v1377_v58 = vld [vmem:[%s637_s11 + $0x20] sm:$0xff]  ;;  %v1374_v61 = vld [vmem:[%s637_s11 + $0x8] sm:$0xff] }
  0x6b   : > { %1291 = vmatmul.msk.bf16.vlgmr.msra.gmra.mxu0 %vm747_vm0, %v726_v2  ;;  %v771_v10 = vmul.f32 128.0, %v1500_v9  ;;  %vm775_vm2 = vweird.f32 %v1500_v9  ;;  %v1495_v45 = vld [vmem:[%s718_s3] ss:$0 sm:$0xff]  ;;  %s724_s9 = scalar_lea.vmem %s2315_s2, %s2174_s5 }
  0x6c   : > { %v1373_v62 = vld [vmem:[%s637_s11] sm:$0xff] }
  0x6d   : > { %v772_v11 = vsub.f32 1.0, %v771_v10  ;;  %990 = vmatpush.bf16.msra.mxu2 %v1379_v56  ;;  %v1496_v8 = vld [vmem:[%s618_s25] ss:$0 sm:$0xff]  ;;  %s715_s25 = scalar_lea.vmem [#allocation17], %s1282_s19 }
  0x6e   : > { %876 = vmatpush.bf16.msra.mxu1 %v1370_v22  ;;  %s1015_s12 = scalar_lea.hbm %s2316_s23, %s1357_s17  ;;  %s1017_s13 = sshll.u32 %s715_s25, 4  ;;  %s1018_s13 = int_to_ptr.vmem [resolvable:$true] %s1017_s13 }
  0x6f   : > { %v773_v12 = vmul.f32 %v1500_v9, %v772_v11  ;;  %v1497_v11 = vld [vmem:[%s627_s10] ss:$0 sm:$0xff]  ;;  %s1019_s10 = sshll.u32 %s1015_s12, 4  ;;  %s1795_s5 = scalar_lea.hbm %s2316_s23, 8  ;;  %s1020_s10 = int_to_ptr.hbm [resolvable:$true] %s1019_s10 }
  0x70   : > { %s1789_s26 = sshra.s32 %s1020_s10, 4  ;;  %s1790_s26 = int_to_ptr.hbm [resolvable:$true] %s1789_s26 }
  0x71   : > { %v774_v13 = vadd.f32 %v1500_v9, %v773_v12  ;;  %991 = vmatpush.bf16.msra.mxu2 %v1378_v57  ;;  %s1791_s16 = scalar_lea.hbm %s1790_s26, 2  ;;  %p1796_p9 = scmp.lt.s32.totalorder %s1790_s26, %s2316_s23 }
  0x72   : > { %877 = vmatpush.bf16.msra.mxu1 %v1369_v23  ;;  %p1792_p6 = scmp.ne.s32.totalorder %s1790_s26, %s1791_s16  ;;  %p1797_p10 = scmp.lt.s32.totalorder %s1795_s5, %s1791_s16 }
  0x73   : > { %v2168_v14 = vsel %vm775_vm2, %v1500_v9, %v774_v13 }
  0x74   : > { %p1793_p7 = pnand %p1792_p6, %p2074_p13  ;;  %p1798_p11 = por %p1797_p10, %p1796_p9 }
  0x75   : > { %992 = vmatpush.bf16.msra.mxu2 %v1377_v58 }
  0x76   : > { %878 = vmatpush.bf16.msra.mxu1 %v1368_v24  ;;  %p1794_p8 = pneg %p1793_p7 }
  0x78   : > { %p1799_p12 = pnand %p1798_p11, %p1794_p8 }
  0x79   : > { %993 = vmatpush.bf16.msra.mxu2 %v1376_v59 }
  0x7a   : > { %879 = vmatpush.bf16.msra.mxu1 %v1367_v25 }
  0x7d   : > { %994 = vmatpush.bf16.msra.mxu2 %v1375_v60 }
  0x7e   : > { %880 = vmatpush.bf16.msra.mxu1 %v1366_v26 }
  0x81   : > { %995 = vmatpush.bf16.msra.mxu2 %v1374_v61 }
  0x82   : > { %881 = vmatpush.bf16.msra.mxu1 %v1365_v27 }
  0x85   : > { %996 = vmatpush.bf16.msra.mxu2 %v1373_v62 }
  0xe8   : > { %v760_v4 = vpop.f32.mrf.mxu0 }
  0xe9   : > { %v761_v5 = vadd.f32 %v1492_v3, %v760_v4 }
  0xeb   : > { %v767_v6 = vsel %vm766_vm1, %v761_v5, 0.0 }
  0xec   : > { %768 = vadd.xlane.f32.xlu0 %v767_v6 }
  0xf0   : > { %v762_v7 = vpop.f32.mrf.mxu0 }
 0x15f   : > { %v769_v15 = vpop.xlane.xlu0 %768 }
 0x160   : > { %v777_v16 = vmul.f32 %v2168_v14, %v769_v15 }
 0x162   : > { %v778_v17 = vsub.f32 %v761_v5, %v777_v16  ;;  %v1498_v16 = vld [vmem:[%s724_s9] ss:$0 sm:$0xff] }
 0x164   : > { %v779_v18 = vmul.f32 %v778_v17, %v778_v17 }
 0x166   : > { %v780_v19 = vsel %vm766_vm1, %v779_v18, 0.0 }
 0x167   : > { %781 = vadd.xlane.f32.xlu0 %v780_v19 }
 0x1da   : > { %v782_v28 = vpop.xlane.xlu0 %781 }
 0x1db   : > { %v783_v29 = vmul.f32 %v782_v28, %v2168_v14 }
 0x1dd   : > { %v784_v30 = vadd.f32 1e-05, %v783_v29 }
 0x1df   : > { %1501 = vrsqrt.f32 %v784_v30  ;;  %vm791_vm4 = vweird.f32 %v784_v30 }
 0x1e5   : > { %v1502_v31 = vpop.eup %1501 }
 0x1e6   : > { %v786_v32 = vmul.f32 %v1502_v31, %v784_v30  ;;  %vm792_vm3 = vweird.f32 %v1502_v31 }
 0x1e7   : > { %vm793_vm5 = vmor %vm791_vm4, %vm792_vm3 }
 0x1e8   : > { %v787_v33 = vmul.f32 %v1502_v31, %v786_v32 }
 0x1ea   : > { %v788_v34 = vmul.f32 0.5, %v787_v33 }
 0x1ec   : > { %v789_v35 = vsub.f32 1.5, %v788_v34 }
 0x1ee   : > { %v790_v36 = vmul.f32 %v1502_v31, %v789_v35 }
 0x1f0   : > { %v794_v38 = vsel %vm793_vm5, %v1502_v31, %v790_v36 }
 0x1f1   : > { %v795_v39 = vmul.f32 %v794_v38, %v778_v17 }
 0x1f3   : > { %v799_v41 = vmul.f32 %v1493_v37, %v795_v39 }
 0x1f5   : > { %v803_v42 = vadd.f32 %v1494_v40, %v799_v41 }
 0x1f7   : > { %v804_v43 = vmax.f32 %v803_v42, 0.0 }
 0x1f9   : > { %v805_v44 = vpack.c.bf16 %v804_v43, %v804_v43 }
 0x1fb   : > { %882 = vmatmul.bf16.vlgmr.msra.gmra.mxu1 %v805_v44 }
 0x278   : > { %v883_v46 = vpop.f32.mrf.mxu1 }
 0x279   : > { %v884_v47 = vadd.f32 %v1495_v45, %v883_v46 }
 0x27b   : > { %v889_v48 = vsel %vm766_vm1, %v884_v47, 0.0 }
 0x27c   : > { %890 = vadd.xlane.f32.xlu1 %v889_v48 }
 0x280   : > { %v885_v49 = vpop.f32.mrf.mxu1 }
 0x2ef   : > { %v891_v50 = vpop.xlane.xlu1 %890 }
 0x2f0   : > { %v892_v51 = vmul.f32 %v891_v50, %v2168_v14 }
 0x2f2   : > { %v893_v52 = vsub.f32 %v884_v47, %v892_v51 }
 0x2f4   : > { %v894_v53 = vmul.f32 %v893_v52, %v893_v52 }
 0x2f6   : > { %v895_v54 = vsel %vm766_vm1, %v894_v53, 0.0 }
 0x2f7   : > { %896 = vadd.xlane.f32.xlu1 %v895_v54 }
 0x36a   : > { %v897_v63 = vpop.xlane.xlu1 %896 }
 0x36b   : > { %v898_v0 = vmul.f32 %v897_v63, %v2168_v14 }
 0x36d   : > { %v899_v1 = vadd.f32 1e-05, %v898_v0 }
 0x36f   : > { %1503 = vrsqrt.f32 %v899_v1  ;;  %vm906_vm7 = vweird.f32 %v899_v1 }
 0x375   : > { %v1504_v2 = vpop.eup %1503 }
 0x376   : > { %v901_v3 = vmul.f32 %v1504_v2, %v899_v1  ;;  %vm907_vm6 = vweird.f32 %v1504_v2 }
 0x377   : > { %vm908_vm8 = vmor %vm906_vm7, %vm907_vm6 }
 0x378   : > { %v902_v4 = vmul.f32 %v1504_v2, %v901_v3 }
 0x37a   : > { %v903_v5 = vmul.f32 0.5, %v902_v4 }
 0x37c   : > { %v904_v6 = vsub.f32 1.5, %v903_v5 }
 0x37e   : > { %v905_v7 = vmul.f32 %v1504_v2, %v904_v6 }
 0x380   : > { %v909_v9 = vsel %vm908_vm8, %v1504_v2, %v905_v7 }
 0x381   : > { %v910_v10 = vmul.f32 %v909_v9, %v893_v52 }
 0x383   : > { %v914_v12 = vmul.f32 %v1496_v8, %v910_v10 }
 0x385   : > { %v918_v13 = vadd.f32 %v1497_v11, %v914_v12 }
 0x387   : > { %v919_v14 = vmax.f32 %v918_v13, 0.0 }
 0x389   : > { %v920_v15 = vpack.c.bf16 %v919_v14, %v919_v14 }
 0x38b   : > { %997 = vmatmul.bf16.vlgmr.msra.gmra.mxu2 %v920_v15 }
 0x40e   : > { %v998_v17 = vpop.f32.mrf.mxu2 }
 0x40f   : > { %v999_v18 = vadd.f32 %v1498_v16, %v998_v17 }
 0x411   : > { %1002 = vst [vmem:[%s715_s25] sm:$0x3] %v999_v18 }
 0x412   : > { %1802 = shalt.err (!%p1799_p12)
}
 0x413   : > { %1401 = dma.vmem_to_hbm [thread:$0]  (%p2074_p13), %s1018_s13, 32, %s1020_s10, %s1004_s20  }
 0x416   : > { %v1000_v19 = vpop.f32.mrf.mxu2 }
 0x417 PF: > { %s2317_s8 = sld [smem:[#allocation24_spill]]  ;;  %p1439_p2 = scmp.ge.s32.totalorder %s1873_s22, 2 }
 0x419   : > { %p1433_p3 = pnand %p1439_p2, %p2078_p0 }
 0x41b   : > { %p1434_p1 = pneg %p1433_p3 }
 0x41d   : > { %s1031_s9 = sand.u32 1, %s2317_s8  }
 0x41e   : > { %s1032_s11 = scalar_lea.sflag [#allocation4], %s1031_s9 }
 0x41f   : > { %1848 = dma.done.wait (%p1434_p1), %s1032_s11, 32  }
 0x420   : > { %1850 = vsyncadd (%p1434_p1), %s1032_s11, 4294967264  ;;  %s37_s22 = sadd.s32 1, %s1873_s22   ;;  %s2319_s19 = sld [smem:[#allocation25_spill]] }
 0x421   : > { %p34_p4 = scmp.ge.s32.totalorder %s37_s22, 6   ;;  %s2320_s30 = sld [smem:[#allocation27_spill]] }
 0x422   : > { %s2321_s27 = sld [smem:[#allocation26_spill]]  ;;  %s2322_s17 = smov %s1857_s18 }
 0x423   : > { %s2325_s20 = smov %s1869_s21 }
 0x424   :  { %36 = sbr.rel (!%p34_p4) target bundleno = 24 (0x18), region = 203 }
 0x426   : > { %s2323_s18 = smov %s2319_s19 }
 0x427   : > { %s2324_s19 = smov %s2320_s30 }
 0x428   : > { %s2326_s21 = smov %s2321_s27 }
 0x429   :  { %1038 = vsyncpa [#allocation3], 1 }
 0x42a   :  { %1040 = vsyncpa [#allocation3 + $0x1], 1 }
 0x42b   :  { %1041 = vsyncpa [#allocation6], 1 }
 0x42c   :  { %1043 = vsyncpa [#allocation6 + $0x1], 1 }
 0x42d   :  { %1044 = vsyncpa [#allocation9], 1 }
 0x42e   :  { %1046 = vsyncpa [#allocation9 + $0x1], 1 }
 0x42f   :  { %1047 = vsyncpa [#allocation12], 1 }
 0x430   :  { %1049 = vsyncpa [#allocation12 + $0x1], 1 }
 0x431   :  { %1050 = vsyncpa [#allocation15], 1 }
 0x432   :  { %1052 = vsyncpa [#allocation15 + $0x1], 1 }
 0x433   :  { %1053 = vsyncpa [#allocation4], 1 }
 0x434   :  { %1055 = vsyncpa [#allocation4 + $0x1], 1 }

</bundles_post_ra>
